<compile_context>
chip_gen: v5e
topology: v5e:2x2
jax: 0.10.0
libtpu: 0.0.40
codegen_flags: <defaults>
</compile_context>

<pallas_src>
import functools

import jax
import jax.numpy as jnp
from jax import lax
from jax.experimental import pallas as pl
from jax.experimental.pallas import tpu as pltpu

# Stand-in for GameRepresentation.PLAY_DESC (trailing "player" features).
PLAY_DESC = 8


def _round_up(x, m):
    return ((x + m - 1) // m) * m


def _repres_partial_kernel(pred_ref, true_ref, out_ref, *, n_rows, block_rows,
                           needs_row_mask):
    d = pred_ref.shape[1]

    # Upcast AFTER the load (inputs may be bf16); all arithmetic in f32.
    diff = pred_ref[...].astype(jnp.float32) - true_ref[...].astype(jnp.float32)
    sq = diff * diff

    if needs_row_mask:
        # Zero rows past the true batch size (partial last block).  Narrow
        # (block_rows, 1) iota broadcast inside the select keeps this cheap.
        i = pl.program_id(0)
        row = lax.broadcasted_iota(jnp.int32, (block_rows, 1), 0) + i * block_rows
        sq = jnp.where(row < n_rows, sq, 0.0)

    # Fold batch rows into one 8-sublane tile: pure vreg adds (VPU slot),
    # no cross-lane / XLU work anywhere in the hot loop.
    out_ref[0] = sq.reshape(block_rows // 8, 8, d).sum(axis=0)


def repres_loss(pred, true, player_weight=1.0, *, play_desc=PLAY_DESC,
                block_rows=None):
    assert pred.shape == true.shape and pred.ndim == 2
    assert pred.dtype == true.dtype
    b, d = pred.shape
    assert d > play_desc

    itemsize = jnp.dtype(pred.dtype).itemsize
    sublane = max(8, 32 // itemsize)                 # 8 f32, 16 bf16, 32 int8
    padded_row_bytes = _round_up(d, 128) * itemsize  # VMEM lane padding

    if block_rows is None:
        # ~4 MiB of (padded) VMEM per input block; 2 inputs x 2 pipeline
        # buffers = ~16 MiB total, safe on every TPU generation.
        budget = 4 * 1024 * 1024
        block_rows = max(sublane, budget // padded_row_bytes)
    block_rows = _round_up(block_rows, sublane)
    block_rows = min(block_rows, _round_up(b, sublane))
    block_rows = max(block_rows, sublane)

    num_blocks = pl.cdiv(b, block_rows)
    needs_row_mask = (b % block_rows) != 0

    kernel = functools.partial(
        _repres_partial_kernel,
        n_rows=b, block_rows=block_rows, needs_row_mask=needs_row_mask)

    partials = pl.pallas_call(
        kernel,
        out_shape=jax.ShapeDtypeStruct((num_blocks, 8, d), jnp.float32),
        grid=(num_blocks,),
        in_specs=[
            pl.BlockSpec((block_rows, d), lambda i: (i, 0)),
            pl.BlockSpec((block_rows, d), lambda i: (i, 0)),
        ],
        out_specs=pl.BlockSpec((1, 8, d), lambda i: (i, 0, 0)),
        compiler_params=pltpu.CompilerParams(
            # Disjoint per-step outputs -> batch axis is fully parallel.
            dimension_semantics=("parallel",),
            vmem_limit_bytes=32 * 1024 * 1024,
        ),
    )(pred, true)

    # Tiny epilogue in plain JAX: finish the (num_blocks, 8, d) reduction and
    # split the map / play columns.  Negligible traffic vs. the main stream.
    col_sums = jnp.sum(partials, axis=(0, 1))            # (d,)
    map_sum = jnp.sum(col_sums[: d - play_desc])
    play_sum = jnp.sum(col_sums[d - play_desc:])
    map_loss = map_sum / float(b * (d - play_desc))
    play_loss = play_sum / float(b * play_desc)
    total = map_loss + player_weight * play_loss
    return total, (map_loss, play_loss)


def _reference(pred, true, player_weight=1.0, play_desc=PLAY_DESC):
    p = pred.astype(jnp.float32)
    t = true.astype(jnp.float32)
    map_loss = jnp.mean((p[:, :-play_desc] - t[:, :-play_desc]) ** 2)
    play_loss = jnp.mean((p[:, -play_desc:] - t[:, -play_desc:]) ** 2)
    return map_loss + player_weight * play_loss, (map_loss, play_loss)


if __name__ == "__main__":
    key = jax.random.PRNGKey(0)
    keys = jax.random.split(key, 6)

    # (B, D, dtype, block_rows, player_weight, rtol)
    cases = [
        (100, 136, jnp.float32, None, 1.0, 1e-5),   # partial block -> row mask
        (256, 136, jnp.float32, 64, 0.5, 1e-5),     # 4 parallel partial blocks
        (256, 136, jnp.bfloat16, 64, 1.0, 1e-4),    # native bf16 in, f32 math
    ]

    for idx, (b, d, dtype, br, w, rtol) in enumerate(cases):
        kp, kt = keys[2 * idx], keys[2 * idx + 1]
        pred = jax.random.normal(kp, (b, d), dtype=jnp.float32).astype(dtype)
        true = jax.random.normal(kt, (b, d), dtype=jnp.float32).astype(dtype)

        total, (m, p) = repres_loss(pred, true, player_weight=w, block_rows=br)
        total = jax.block_until_ready(total)
        m = jax.block_until_ready(m)
        p = jax.block_until_ready(p)

        ref_total, (ref_m, ref_p) = _reference(pred, true, player_weight=w)

        assert jnp.allclose(m, ref_m, rtol=rtol, atol=1e-6), (idx, m, ref_m)
        assert jnp.allclose(p, ref_p, rtol=rtol, atol=1e-6), (idx, p, ref_p)
        assert jnp.allclose(total, ref_total, rtol=rtol, atol=1e-6), (
            idx, total, ref_total)

    print("KERNEL_OK")
</pallas_src>

<mosaic_0001>
module attributes {stable_mosaic.version = 11 : i64} {
  func.func @_repres_partial_kernel(%arg0: i32, %arg1: memref<104x136xf32, #tpu.memory_space<vmem>>, %arg2: memref<104x136xf32, #tpu.memory_space<vmem>>, %arg3: memref<1x8x136xf32, #tpu.memory_space<vmem>>) attributes {dimension_semantics = [#tpu.dimension_semantics<parallel>], iteration_bounds = array<i64: 1>, scalar_prefetch = 0 : i64, scratch_operands = 0 : i64, tpu.core_type = #tpu.core_type<tc>, window_params = [{transform_indices = @transform_0, window_bounds = array<i64: 104, 136>}, {transform_indices = @transform_1, window_bounds = array<i64: 104, 136>}, {transform_indices = @transform_2, window_bounds = array<i64: 1, 8, 136>}]} {
    %c0 = arith.constant 0 : index
    %c0_0 = arith.constant 0 : index
    %0 = vector.load %arg1[%c0, %c0_0] : memref<104x136xf32, #tpu.memory_space<vmem>>, vector<104x136xf32>
    %c0_1 = arith.constant 0 : index
    %c0_2 = arith.constant 0 : index
    %1 = vector.load %arg2[%c0_1, %c0_2] : memref<104x136xf32, #tpu.memory_space<vmem>>, vector<104x136xf32>
    %2 = arith.subf %0, %1 : vector<104x136xf32>
    %3 = arith.mulf %2, %2 : vector<104x136xf32>
    %4 = tpu.iota {dimensions = array<i32: 0>} : vector<104x1xi32>
    %c104_i32 = arith.constant 104 : i32
    %5 = arith.muli %arg0, %c104_i32 : i32
    %6 = vector.broadcast %5 : i32 to vector<104x1xi32>
    %7 = arith.addi %4, %6 : vector<104x1xi32>
    %c100_i32 = arith.constant 100 : i32
    %8 = vector.broadcast %c100_i32 : i32 to vector<104x1xi32>
    %9 = arith.cmpi slt, %7, %8 : vector<104x1xi32>
    %cst = arith.constant 0.000000e+00 : f32
    %10 = vector.shape_cast %9 : vector<104x1xi1> to vector<104x1xi1>
    %11 = vector.broadcast %10 : vector<104x1xi1> to vector<104x136xi1>
    %12 = vector.broadcast %cst : f32 to vector<104x136xf32>
    %13 = arith.select %11, %3, %12 : vector<104x136xi1>, vector<104x136xf32>
    %14 = vector.shape_cast %13 : vector<104x136xf32> to vector<13x8x136xf32>
    %cst_3 = arith.constant dense<0.000000e+00> : vector<8x136xf32>
    %15 = vector.multi_reduction <add>, %14, %cst_3 [0] : vector<13x8x136xf32> to vector<8x136xf32>
    %c0_4 = arith.constant 0 : index
    %c0_5 = arith.constant 0 : index
    %c0_6 = arith.constant 0 : index
    %16 = vector.load %arg3[%c0_4, %c0_5, %c0_6] : memref<1x8x136xf32, #tpu.memory_space<vmem>>, vector<1x8x136xf32>
    %17 = vector.shape_cast %16 : vector<1x8x136xf32> to vector<8x136xf32>
    %18 = vector.shape_cast %15 : vector<8x136xf32> to vector<1x8x136xf32>
    tpu.vector_store %arg3[%c0_4, %c0_5, %c0_6], %18 {strides = array<i32>} : memref<1x8x136xf32, #tpu.memory_space<vmem>>, vector<1x8x136xf32>,
    return
  }
  func.func @transform_0(%arg0: i32) -> (i32, i32) {
    %c0_i32 = arith.constant 0 : i32
    %c0_i32_0 = arith.constant 0 : i32
    return %arg0, %c0_i32 : i32, i32
  }
  func.func @transform_1(%arg0: i32) -> (i32, i32) {
    %c0_i32 = arith.constant 0 : i32
    %c0_i32_0 = arith.constant 0 : i32
    return %arg0, %c0_i32 : i32, i32
  }
  func.func @transform_2(%arg0: i32) -> (i32, i32, i32) {
    %c0_i32 = arith.constant 0 : i32
    %c0_i32_0 = arith.constant 0 : i32
    %c0_i32_1 = arith.constant 0 : i32
    return %arg0, %c0_i32, %c0_i32_0 : i32, i32, i32
  }
}

</mosaic_0001>

<bundles_post_ra>
// kernel: tpu_custom_call.1
= control target key start
LH: loop header
LB: loop body
LE: loop exit
PB: predicated region body
PF: predicated region fallthrough
CT: control target
= control target key end

     0   :  { %v116_v26 = vlaneseq  ;;  %s489_s0 = inlined_call_operand.vmem [shape: f32[100,136], index: 0, kind: input, shape index: {}]   ;;  %s490_s1 = inlined_call_operand.vmem [shape: f32[100,136], index: 1, kind: input, shape index: {}]   ;;  %s491_s2 = inlined_call_operand.hbm [shape: f32[1,8,136], index: 2, kind: output, shape index: {}]  }
   0x1   :  { %v12_v0 = vld [vmem:[%s489_s0] sm:$0xff]  ;;  %v14_v1 = vld [vmem:[%s489_s0 + $0x10] sm:$0xff]  ;;  %v13_v23 = vld [vmem:[%s489_s0 + $0x8] sm:$0xff] }
   0x2   :  { %v16_v2 = vld [vmem:[%s489_s0 + $0x20] sm:$0xff]  ;;  %v40_v4 = vld [vmem:[%s490_s1 + $0x10] sm:$0xff]  ;;  %v15_v24 = vld [vmem:[%s489_s0 + $0x18] sm:$0xff]  ;;  %v117_v50 = vshrl.u32 %v116_v26, 7 }
   0x3   :  { %v38_v3 = vld [vmem:[%s490_s1] sm:$0xff]  ;;  %v18_v7 = vld [vmem:[%s489_s0 + $0x30] sm:$0xff]  ;;  %v66_v9 = vsub.f32 %v14_v1, %v40_v4  ;;  %v17_v27 = vld [vmem:[%s489_s0 + $0x28] sm:$0xff] }
   0x4   :  { %v42_v5 = vld [vmem:[%s490_s1 + $0x20] sm:$0xff]  ;;  %v64_v6 = vsub.f32 %v12_v0, %v38_v3  ;;  %v44_v8 = vld [vmem:[%s490_s1 + $0x30] sm:$0xff]  ;;  %v19_v28 = vld [vmem:[%s489_s0 + $0x38] sm:$0xff] }
   0x5   :  { %v68_v10 = vsub.f32 %v16_v2, %v42_v5  ;;  %v20_v11 = vld [vmem:[%s489_s0 + $0x40] sm:$0xff]  ;;  %v70_v13 = vsub.f32 %v18_v7, %v44_v8  ;;  %v92_v15 = vmul.f32 %v66_v9, %v66_v9  ;;  %v22_v16 = vld [vmem:[%s489_s0 + $0x50] sm:$0xff]  ;;  %v21_v32 = vld [vmem:[%s489_s0 + $0x48] sm:$0xff] }
   0x6   :  { %v46_v12 = vld [vmem:[%s490_s1 + $0x40] sm:$0xff]  ;;  %v90_v14 = vmul.f32 %v64_v6, %v64_v6  ;;  %v48_v18 = vld [vmem:[%s490_s1 + $0x50] sm:$0xff]  ;;  %v39_v33 = vld [vmem:[%s490_s1 + $0x8] sm:$0xff] }
   0x7   :  { %v24_v17 = vld [vmem:[%s489_s0 + $0x60] sm:$0xff]  ;;  %v26_v19 = vld [vmem:[%s489_s0 + $0x70] sm:$0xff]  ;;  %v72_v21 = vsub.f32 %v20_v11, %v46_v12  ;;  %v94_v22 = vmul.f32 %v68_v10, %v68_v10  ;;  %v74_v29 = vsub.f32 %v22_v16, %v48_v18  ;;  %v96_v30 = vmul.f32 %v70_v13, %v70_v13  ;;  %v41_v34 = vld [vmem:[%s490_s1 + $0x18] sm:$0xff] }
   0x8   :  { %v50_v20 = vld [vmem:[%s490_s1 + $0x60] sm:$0xff]  ;;  %v52_v25 = vld [vmem:[%s490_s1 + $0x70] sm:$0xff]  ;;  %v210_v31 = vadd.f32 %v92_v15, %v90_v14  ;;  %v43_v36 = vld [vmem:[%s490_s1 + $0x28] sm:$0xff]  ;;  %v65_v39 = vsub.f32 %v13_v23, %v39_v33  ;;  %v67_v40 = vsub.f32 %v15_v24, %v41_v34 }
   0x9   :  { %v76_v35 = vsub.f32 %v24_v17, %v50_v20  ;;  %v45_v37 = vld [vmem:[%s490_s1 + $0x38] sm:$0xff]  ;;  %v47_v38 = vld [vmem:[%s490_s1 + $0x48] sm:$0xff]  ;;  %v28_v41 = vld [vmem:[%s489_s0 + $0x80] sm:$0xff]  ;;  %v98_v44 = vmul.f32 %v72_v21, %v72_v21  ;;  %v69_v46 = vsub.f32 %v17_v27, %v43_v36  ;;  %v78_v49 = vsub.f32 %v26_v19, %v52_v25 }
   0xa   :  { %v30_v42 = vld [vmem:[%s489_s0 + $0x90] sm:$0xff]  ;;  %v54_v43 = vld [vmem:[%s490_s1 + $0x80] sm:$0xff]  ;;  %v211_v45 = vadd.f32 %v210_v31, %v94_v22  ;;  %v71_v47 = vsub.f32 %v19_v28, %v45_v37  ;;  %v23_v51 = vld [vmem:[%s489_s0 + $0x58] sm:$0xff]  ;;  %v100_v53 = vmul.f32 %v74_v29, %v74_v29  ;;  %v73_v57 = vsub.f32 %v21_v32, %v47_v38 }
   0xb   :  { %v56_v48 = vld [vmem:[%s490_s1 + $0x90] sm:$0xff]  ;;  %v49_v52 = vld [vmem:[%s490_s1 + $0x58] sm:$0xff]  ;;  %v25_v55 = vld [vmem:[%s489_s0 + $0x68] sm:$0xff]  ;;  %v91_v58 = vmul.f32 %v65_v39, %v65_v39 }
   0xc   :  { %v212_v54 = vadd.f32 %v211_v45, %v96_v30  ;;  %v51_v56 = vld [vmem:[%s490_s1 + $0x68] sm:$0xff] }
   0xd   :  { %7 = vsyncpa [#allocation3], 0  ;;  %v80_v59 = vsub.f32 %v28_v41, %v54_v43  ;;  %v93_v60 = vmul.f32 %v67_v40, %v67_v40  ;;  %v95_v61 = vmul.f32 %v69_v46, %v69_v46  ;;  %vm222_vm0 = vcmask 64512   ;;  %v32_v62 = vld [vmem:[%s489_s0 + $0xa0] sm:$0xff]  ;;  %v34_v4 = vld [vmem:[%s489_s0 + $0xb0] sm:$0xff]  ;;  %s257_s3 = sshll.u32 %s491_s2, 4  ;;  %s258_s3 = int_to_ptr.hbm [resolvable:$true] %s257_s3 }
   0xe   :  { %v58_v63 = vld [vmem:[%s490_s1 + $0xa0] sm:$0xff]  ;;  %v102_v0 = vmul.f32 %v76_v35, %v76_v35  ;;  %v213_v1 = vadd.f32 %v212_v54, %v98_v44  ;;  %v75_v2 = vsub.f32 %v23_v51, %v49_v52  ;;  %v97_v3 = vmul.f32 %v71_v47, %v71_v47  ;;  %v27_v8 = vld [vmem:[%s489_s0 + $0x78] sm:$0xff]  ;;  %v60_v12 = vld [vmem:[%s490_s1 + $0xb0] sm:$0xff] }
   0xf   :  { %v82_v5 = vsub.f32 %v30_v42, %v56_v48  ;;  %v104_v6 = vmul.f32 %v78_v49, %v78_v49  ;;  %v420_v7 = vadd.s32 96, %v117_v50  ;;  %v53_v9 = vld [vmem:[%s490_s1 + $0x78] sm:$0xff]  ;;  %v77_v10 = vsub.f32 %v25_v55, %v51_v56  ;;  %v36_v11 = vld [vmem:[%s489_s0 + $0xc0] sm:$0xff]  ;;  %v29_v20 = vld [vmem:[%s489_s0 + $0x88] sm:$0xff] }
  0x10   :  { %v62_v13 = vld [vmem:[%s490_s1 + $0xc0] sm:$0xff]  ;;  %v214_v14 = vadd.f32 %v213_v1, %v100_v53  ;;  %v99_v15 = vmul.f32 %v73_v57, %v73_v57  ;;  %v223_v16 = vsel %vm222_vm0, %v91_v58, 0.0  ;;  %v224_v17 = vsel %vm222_vm0, %v93_v60, 0.0  ;;  %v55_v21 = vld [vmem:[%s490_s1 + $0x88] sm:$0xff]  ;;  %v31_v31 = vld [vmem:[%s489_s0 + $0x98] sm:$0xff] }
  0x11   :  { %v84_v18 = vsub.f32 %v32_v62, %v58_v63  ;;  %v106_v19 = vmul.f32 %v80_v59, %v80_v59  ;;  %v225_v22 = vadd.f32 %v224_v17, %v223_v16  ;;  %v226_v23 = vsel %vm222_vm0, %v95_v61, 0.0  ;;  %v57_v32 = vld [vmem:[%s490_s1 + $0x98] sm:$0xff]  ;;  %v33_v39 = vld [vmem:[%s489_s0 + $0xa8] sm:$0xff] }
  0x12   :  { %v215_v24 = vadd.f32 %v214_v14, %v102_v0  ;;  %v79_v25 = vsub.f32 %v27_v8, %v53_v9  ;;  %v101_v26 = vmul.f32 %v75_v2, %v75_v2  ;;  %v228_v27 = vsel %vm222_vm0, %v97_v3, 0.0  ;;  %v59_v40 = vld [vmem:[%s490_s1 + $0xa8] sm:$0xff]  ;;  %v35_v50 = vld [vmem:[%s489_s0 + $0xb8] sm:$0xff] }
  0x13   :  { %v86_v28 = vsub.f32 %v34_v4, %v60_v12  ;;  %v88_v29 = vsub.f32 %v36_v11, %v62_v13  ;;  %v108_v30 = vmul.f32 %v82_v5, %v82_v5  ;;  %v227_v33 = vadd.f32 %v226_v23, %v225_v22  ;;  %v37_v42 = vld [vmem:[%s489_s0 + $0xc8] sm:$0xff]  ;;  %v61_v51 = vld [vmem:[%s490_s1 + $0xb8] sm:$0xff]  ;;  %s293_s0 = smov [#allocation2]  }
  0x14   :  { %v216_v34 = vadd.f32 %v215_v24, %v104_v6  ;;  %v81_v35 = vsub.f32 %v29_v20, %v55_v21  ;;  %v103_v36 = vmul.f32 %v77_v10, %v77_v10  ;;  %v230_v37 = vsel %vm222_vm0, %v99_v15, 0.0  ;;  %v63_v43 = vld [vmem:[%s490_s1 + $0xc8] sm:$0xff]  ;;  %s255_s1 = sshll.u32 %s293_s0, 4  ;;  %s256_s1 = int_to_ptr.vmem [resolvable:$true] %s255_s1 }
  0x15   :  { %v110_v38 = vmul.f32 %v84_v18, %v84_v18  ;;  %v229_v41 = vadd.f32 %v228_v27, %v227_v33  ;;  %v83_v45 = vsub.f32 %v31_v31, %v57_v32  ;;  %v105_v46 = vmul.f32 %v79_v25, %v79_v25 }
  0x16   :  { %v217_v44 = vadd.f32 %v216_v34, %v106_v19  ;;  %v232_v47 = vsel %vm222_vm0, %v101_v26, 0.0  ;;  %v112_v48 = vmul.f32 %v86_v28, %v86_v28  ;;  %v114_v49 = vmul.f32 %v88_v29, %v88_v29 }
  0x17   :  { %vm157_vm1 = vcmp.lt.s32.totalorder %v420_v7, 100  ;;  %v231_v52 = vadd.f32 %v230_v37, %v229_v41  ;;  %v85_v54 = vsub.f32 %v33_v39, %v59_v40  ;;  %v107_v55 = vmul.f32 %v81_v35, %v81_v35 }
  0x18   :  { %v218_v53 = vadd.f32 %v217_v44, %v108_v30  ;;  %v234_v56 = vsel %vm222_vm0, %v103_v36, 0.0  ;;  %v89_v57 = vsub.f32 %v37_v42, %v63_v43  ;;  %v87_v60 = vsub.f32 %v35_v50, %v61_v51 }
  0x19   :  { %v233_v58 = vadd.f32 %v232_v47, %v231_v52  ;;  %v109_v61 = vmul.f32 %v83_v45, %v83_v45  ;;  %v236_v62 = vsel %vm222_vm0, %v105_v46, 0.0  ;;  %v208_v63 = vsel %vm157_vm1, %v114_v49, 0.0 }
  0x1a   :  { %v219_v59 = vadd.f32 %v218_v53, %v110_v38  ;;  %v111_v2 = vmul.f32 %v85_v54, %v85_v54  ;;  %v238_v3 = vsel %vm222_vm0, %v107_v55, 0.0  ;;  %v115_v4 = vmul.f32 %v89_v57, %v89_v57 }
  0x1b   :  { %v235_v0 = vadd.f32 %v234_v56, %v233_v58  ;;  %v113_v8 = vmul.f32 %v87_v60, %v87_v60  ;;  %v240_v9 = vsel %vm222_vm0, %v109_v61, 0.0 }
  0x1c   :  { %v220_v1 = vadd.f32 %v219_v59, %v112_v48  ;;  %v242_v11 = vsel %vm222_vm0, %v111_v2, 0.0  ;;  %v209_v12 = vsel %vm157_vm1, %v115_v4, 0.0 }
  0x1d   :  { %v237_v5 = vadd.f32 %v236_v62, %v235_v0  ;;  %v244_v14 = vsel %vm222_vm0, %v113_v8, 0.0  ;;  %v246_v16 = vsel %vm222_vm0, %v209_v12, 0.0 }
  0x1e   :  { %v221_v6 = vadd.f32 %v220_v1, %v208_v63 }
  0x1f   :  { %v239_v10 = vadd.f32 %v238_v3, %v237_v5 }
  0x20   :  { %248 = vst [vmem:[#allocation2] sm:$0xff] %v221_v6 }
  0x21   :  { %v241_v13 = vadd.f32 %v240_v9, %v239_v10 }
  0x23   :  { %v243_v15 = vadd.f32 %v242_v11, %v241_v13 }
  0x25   :  { %v245_v17 = vadd.f32 %v244_v14, %v243_v15 }
  0x27   :  { %v247_v18 = vadd.f32 %v246_v16, %v245_v17 }
  0x29   :  { %249 = vst.msk [vmem:[#allocation2 + $0x8] sm:$0xff] %vm222_vm0, %v247_v18 }
  0x2a   :  { %260 = dma.vmem_to_hbm [thread:$0]  %s256_s1, 256, %s258_s3, [#allocation3]  }
  0x2b   :  { %291 = dma.done.wait [#allocation3], 256  }
  0x2c   :  { %292 = vsyncadd [#allocation3], 4294967040 }
  0x2d   :  { %265 = vsyncpa [#allocation3], 1 }

</bundles_post_ra>
